<compile_context>
chip_gen: v7x
topology: tpu7x:2x2x1
jax: 0.10.0
libtpu: 0.0.40
codegen_flags: <defaults>
</compile_context>

<pallas_src>
import functools
import math

import jax
import jax.numpy as jnp
from jax.experimental import pallas as pl
from jax.experimental.pallas import tpu as pltpu


def _kv_compose_kernel(x_ref, wk_ref, bk_ref, wv_ref, bv_ref, wq_ref, bq_ref,
                       mask_ref, wo_ref, bo_ref, m_ref, bp_ref, kv_acc,
                       *, compute_dtype=None):
    """Per-(batch, kv-chunk) grid point: accumulate KᵀV, finalize composed m/b'.

    x_ref:    (tKV, D)  sequence chunk of x (batch dim squeezed)
    wk/wv/wq: (D, D)    in_proj weights split per K/V/Q (pre-transposed: x @ W)
    bk/bv/bq: (1, D)    in_proj biases split per K/V/Q (f32)
    mask_ref: (D, D)    block-diagonal head mask with 1/sqrt(d_head) folded in
    wo_ref:   (D, D)    out_proj weight (pre-transposed)
    bo_ref:   (1, D)    out_proj bias (f32)
    m_ref:    (D, D)    OUT: w_q @ ((KᵀV ∘ mask) @ w_out)
    bp_ref:   (1, D)    OUT: b_q @ ((KᵀV ∘ mask) @ w_out) + b_out
    kv_acc:   (D, D)    f32 scratch accumulator for the packed KᵀV
    """
    f32 = jnp.float32
    c = pl.program_id(1)

    @pl.when(c == 0)
    def _init():
        kv_acc[...] = jnp.zeros_like(kv_acc)

    def mx(t):  # optional low-precision MXU operands; accumulation stays f32
        return t if compute_dtype is None else t.astype(compute_dtype)

    x = x_ref[...]                                                  # (tKV, D)
    k = jnp.dot(x, wk_ref[...], preferred_element_type=f32) + bk_ref[...]
    v = jnp.dot(x, wv_ref[...], preferred_element_type=f32) + bv_ref[...]
    kv_acc[...] += jnp.dot(mx(k).T, mx(v), preferred_element_type=f32)

    @pl.when(c == pl.num_programs(1) - 1)
    def _finalize():
        # Per-batch (D,D) matmuls kept in f32 — negligible cost, keeps the
        # cached / composed operands accurate (per the review's note).
        kv = kv_acc[...] * mask_ref[...]          # blockdiag(K_hᵀ V_h) / sqrt(d_h)
        mo = jnp.dot(kv, wo_ref[...].astype(f32), preferred_element_type=f32)
        m = jnp.dot(wq_ref[...].astype(f32), mo, preferred_element_type=f32)
        bp = jnp.dot(bq_ref[...], mo, preferred_element_type=f32) + bo_ref[...]
        m_ref[...] = m.astype(m_ref.dtype)
        bp_ref[...] = bp.astype(bp_ref.dtype)


def _apply_kernel(x_ref, m_ref, bp_ref, o_ref):
    """Per-(batch, query-tile): the whole attention collapses to x @ m + b'."""
    y = jnp.dot(x_ref[...], m_ref[...],
                preferred_element_type=jnp.float32) + bp_ref[...]
    o_ref[...] = y.astype(o_ref.dtype)


def self_attention_pallas(x, w_in, b_in, w_out, b_out, n_heads, *,
                          block_q=256, block_kv=512, compute_dtype=None,
                          vmem_limit_bytes=None):
    """x: (B, S, D).  Weights already transposed to (in_dim, out_dim):
    w_in (D, 3D), b_in (1, 3D), w_out (D, D), b_out (1, D)."""
    B, S, D = x.shape
    assert D % n_heads == 0
    d_head = D // n_heads
    out_dtype = x.dtype
    f32 = jnp.float32

    tS = min(block_q, S)
    tKV = min(block_kv, S)
    assert S % tS == 0 and S % tKV == 0, "S must divide the tile sizes"
    n_q, n_kv = S // tS, S // tKV

    # Host-side layout plumbing (free): split fused in_proj per Q/K/V and build
    # the scaled block-diagonal head mask (folds in 1/sqrt(d_head)).
    w_q, w_k, w_v = w_in[:, :D], w_in[:, D:2 * D], w_in[:, 2 * D:]
    b_q = b_in[:, :D].astype(f32)
    b_k = b_in[:, D:2 * D].astype(f32)
    b_v = b_in[:, 2 * D:].astype(f32)
    b_o = b_out.astype(f32)
    head_id = jnp.arange(D, dtype=jnp.int32) // d_head
    head_mask = ((head_id[:, None] == head_id[None, :]).astype(f32)
                 * (1.0 / math.sqrt(d_head)))

    w_o = w_out
    if compute_dtype is not None:
        # Cast the big streaming operands on the host (halves DMA + MXU-native
        # rate); biases / mask / accumulators / composed bias stay f32.
        x = x.astype(compute_dtype)
        w_q, w_k, w_v, w_o = (w.astype(compute_dtype)
                              for w in (w_q, w_k, w_v, w_o))
    m_dtype = f32 if compute_dtype is None else compute_dtype

    def cparams(sem):
        kw = dict(dimension_semantics=sem)
        if vmem_limit_bytes is not None:
            kw["vmem_limit_bytes"] = vmem_limit_bytes
        return pltpu.CompilerParams(**kw)

    rep2 = lambda b, i: (0, 0)   # grid-invariant weights / biases / mask

    # ---- Phase 1: per-batch KᵀV accumulation + composition with w_q / w_out.
    kv_kernel = functools.partial(_kv_compose_kernel, compute_dtype=compute_dtype)
    m, bp = pl.pallas_call(
        kv_kernel,
        out_shape=(jax.ShapeDtypeStruct((B, D, D), m_dtype),
                   jax.ShapeDtypeStruct((B, 1, D), f32)),
        grid=(B, n_kv),
        in_specs=[
            pl.BlockSpec((None, tKV, D), lambda b, c: (b, c, 0)),  # x chunk
            pl.BlockSpec((D, D), rep2),    # w_k
            pl.BlockSpec((1, D), rep2),    # b_k
            pl.BlockSpec((D, D), rep2),    # w_v
            pl.BlockSpec((1, D), rep2),    # b_v
            pl.BlockSpec((D, D), rep2),    # w_q
            pl.BlockSpec((1, D), rep2),    # b_q
            pl.BlockSpec((D, D), rep2),    # scaled block-diag head mask
            pl.BlockSpec((D, D), rep2),    # w_out
            pl.BlockSpec((1, D), rep2),    # b_out
        ],
        out_specs=(pl.BlockSpec((None, D, D), lambda b, c: (b, 0, 0)),
                   pl.BlockSpec((None, 1, D), lambda b, c: (b, 0, 0))),
        scratch_shapes=[pltpu.VMEM((D, D), f32)],
        compiler_params=cparams(("parallel", "arbitrary")),
    )(x, w_k, b_k, w_v, b_v, w_q, b_q, head_mask, w_o, b_o)

    # ---- Phase 2: per query tile, a single MXU matmul: y = x_tile @ m + b'.
    out = pl.pallas_call(
        _apply_kernel,
        out_shape=jax.ShapeDtypeStruct((B, S, D), out_dtype),
        grid=(B, n_q),
        in_specs=[
            pl.BlockSpec((None, tS, D), lambda b, q: (b, q, 0)),   # x query tile
            pl.BlockSpec((None, D, D), lambda b, q: (b, 0, 0)),    # composed m
            pl.BlockSpec((None, 1, D), lambda b, q: (b, 0, 0)),    # composed bias
        ],
        out_specs=pl.BlockSpec((None, tS, D), lambda b, q: (b, q, 0)),
        compiler_params=cparams(("parallel", "parallel")),
    )(x, m, bp)
    return out


def self_attention_ref(x, w_in, b_in, w_out, b_out, n_heads):
    """Pure-JAX reference mirroring the (runnable interpretation of the) PyTorch forward."""
    B, S, D = x.shape
    d_head = D // n_heads
    qkv = x @ w_in + b_in[None, :, :]                 # (B, S, 3D)
    q, k, v = jnp.split(qkv, 3, axis=-1)

    def to_heads(t):                                  # (B, S, D) -> (B, H, S, dh)
        return t.reshape(B, S, n_heads, d_head).transpose(0, 2, 1, 3)

    q, k, v = to_heads(q), to_heads(k), to_heads(v)
    w = jnp.einsum('bhqd,bhkd->bhqk', q, k) / math.sqrt(d_head)  # no softmax (as in ref)
    o = jnp.einsum('bhqk,bhkd->bhqd', w, v)
    o = o.transpose(0, 2, 1, 3).reshape(B, S, D)
    return o @ w_out + b_out[None, :, :]


if __name__ == "__main__":
    B, S, D = 2, 8, 32
    n_heads = 2

    key = jax.random.PRNGKey(0)
    kx, k1, k2, k3, k4 = jax.random.split(key, 5)

    x = jax.random.normal(kx, (B, S, D), dtype=jnp.float32)

    # PyTorch Linear stores W as (out, in); we keep the transposed (in, out)
    # layout so the kernel does x @ W.
    lim_in = 1.0 / math.sqrt(D)
    w_in = jax.random.uniform(k1, (D, 3 * D), jnp.float32, -lim_in, lim_in)
    b_in = jax.random.uniform(k2, (1, 3 * D), jnp.float32, -lim_in, lim_in)
    w_out = jax.random.uniform(k3, (D, D), jnp.float32, -lim_in, lim_in)
    b_out = jax.random.uniform(k4, (1, D), jnp.float32, -lim_in, lim_in)

    # f32 path: checked against the pure-JAX reference at tight tolerance.
    out = self_attention_pallas(x, w_in, b_in, w_out, b_out, n_heads)
    out = jax.block_until_ready(out)
    ref = self_attention_ref(x, w_in, b_in, w_out, b_out, n_heads)
    assert out.shape == (B, S, D)
    assert jnp.allclose(out, ref, atol=1e-4, rtol=1e-4), "mismatch vs reference"

    # bf16 production path (MXU-native operands, f32 accumulation): smoke run.
    out_bf16 = self_attention_pallas(x, w_in, b_in, w_out, b_out, n_heads,
                                     compute_dtype=jnp.bfloat16)
    jax.block_until_ready(out_bf16)

    print("KERNEL_OK")
</pallas_src>

<mosaic_0001>
module attributes {stable_mosaic.version = 11 : i64} {
  func.func @_kv_compose_kernel(%arg0: i32, %arg1: i32, %arg2: memref<1x8x32xf32, #tpu.memory_space<vmem>>, %arg3: memref<32x32xf32, #tpu.memory_space<vmem>>, %arg4: memref<1x32xf32, #tpu.memory_space<vmem>>, %arg5: memref<32x32xf32, #tpu.memory_space<vmem>>, %arg6: memref<1x32xf32, #tpu.memory_space<vmem>>, %arg7: memref<32x32xf32, #tpu.memory_space<vmem>>, %arg8: memref<1x32xf32, #tpu.memory_space<vmem>>, %arg9: memref<32x32xf32, #tpu.memory_space<vmem>>, %arg10: memref<32x32xf32, #tpu.memory_space<vmem>>, %arg11: memref<1x32xf32, #tpu.memory_space<vmem>>, %arg12: memref<1x32x32xf32, #tpu.memory_space<vmem>>, %arg13: memref<1x1x32xf32, #tpu.memory_space<vmem>>, %arg14: memref<32x32xf32, #tpu.memory_space<vmem>>) attributes {dimension_semantics = [#tpu.dimension_semantics<parallel>, #tpu.dimension_semantics<arbitrary>], iteration_bounds = array<i64: 2, 1>, scalar_prefetch = 0 : i64, scratch_operands = 1 : i64, tpu.core_type = #tpu.core_type<tc>, window_params = [{transform_indices = @transform_0, window_bounds = array<i64: 1, 8, 32>}, {pipeline_mode = #tpu.pipeline_mode<synchronous>, transform_indices = @transform_1, window_bounds = array<i64: 32, 32>}, {pipeline_mode = #tpu.pipeline_mode<synchronous>, transform_indices = @transform_2, window_bounds = array<i64: 1, 32>}, {pipeline_mode = #tpu.pipeline_mode<synchronous>, transform_indices = @transform_3, window_bounds = array<i64: 32, 32>}, {pipeline_mode = #tpu.pipeline_mode<synchronous>, transform_indices = @transform_4, window_bounds = array<i64: 1, 32>}, {pipeline_mode = #tpu.pipeline_mode<synchronous>, transform_indices = @transform_5, window_bounds = array<i64: 32, 32>}, {pipeline_mode = #tpu.pipeline_mode<synchronous>, transform_indices = @transform_6, window_bounds = array<i64: 1, 32>}, {pipeline_mode = #tpu.pipeline_mode<synchronous>, transform_indices = @transform_7, window_bounds = array<i64: 32, 32>}, {pipeline_mode = #tpu.pipeline_mode<synchronous>, transform_indices = @transform_8, window_bounds = array<i64: 32, 32>}, {pipeline_mode = #tpu.pipeline_mode<synchronous>, transform_indices = @transform_9, window_bounds = array<i64: 1, 32>}, {transform_indices = @transform_10, window_bounds = array<i64: 1, 32, 32>}, {transform_indices = @transform_11, window_bounds = array<i64: 1, 1, 32>}]} {
    %c0_i32 = arith.constant 0 : i32
    %0 = arith.cmpi eq, %arg1, %c0_i32 : i32
    %1 = arith.extui %0 : i1 to i32
    %c0_i32_0 = arith.constant 0 : i32
    %2 = arith.cmpi ne, %1, %c0_i32_0 : i32
    scf.if %2 {
      %cst_19 = arith.constant 0.000000e+00 : f32
      %23 = vector.broadcast %cst_19 : f32 to vector<32x32xf32>
      %c0_20 = arith.constant 0 : index
      %c0_21 = arith.constant 0 : index
      %24 = vector.load %arg14[%c0_20, %c0_21] : memref<32x32xf32, #tpu.memory_space<vmem>>, vector<32x32xf32>
      tpu.vector_store %arg14[%c0_20, %c0_21], %23 {strides = array<i32>} : memref<32x32xf32, #tpu.memory_space<vmem>>, vector<32x32xf32>,
    } else {
    }
    %c0 = arith.constant 0 : index
    %c0_1 = arith.constant 0 : index
    %c0_2 = arith.constant 0 : index
    %3 = vector.load %arg2[%c0, %c0_1, %c0_2] : memref<1x8x32xf32, #tpu.memory_space<vmem>>, vector<1x8x32xf32>
    %4 = vector.shape_cast %3 : vector<1x8x32xf32> to vector<8x32xf32>
    %c0_3 = arith.constant 0 : index
    %c0_4 = arith.constant 0 : index
    %5 = vector.load %arg3[%c0_3, %c0_4] : memref<32x32xf32, #tpu.memory_space<vmem>>, vector<32x32xf32>
    %cst = arith.constant dense<0.000000e+00> : vector<8x32xf32>
    %6 = tpu.matmul %4, %5, %cst {dimension_numbers = #tpu.dot_dimension_numbers<[1], [0], [0], [1], [0, 0, 1, 1], [], []>} : vector<8x32xf32>, vector<32x32xf32>, vector<8x32xf32> -> vector<8x32xf32>
    %c0_5 = arith.constant 0 : index
    %c0_6 = arith.constant 0 : index
    %7 = vector.load %arg4[%c0_5, %c0_6] : memref<1x32xf32, #tpu.memory_space<vmem>>, vector<1x32xf32>
    %8 = vector.broadcast %7 : vector<1x32xf32> to vector<8x32xf32>
    %9 = arith.addf %6, %8 : vector<8x32xf32>
    %c0_7 = arith.constant 0 : index
    %c0_8 = arith.constant 0 : index
    %10 = vector.load %arg5[%c0_7, %c0_8] : memref<32x32xf32, #tpu.memory_space<vmem>>, vector<32x32xf32>
    %cst_9 = arith.constant dense<0.000000e+00> : vector<8x32xf32>
    %11 = tpu.matmul %4, %10, %cst_9 {dimension_numbers = #tpu.dot_dimension_numbers<[1], [0], [0], [1], [0, 0, 1, 1], [], []>} : vector<8x32xf32>, vector<32x32xf32>, vector<8x32xf32> -> vector<8x32xf32>
    %c0_10 = arith.constant 0 : index
    %c0_11 = arith.constant 0 : index
    %12 = vector.load %arg6[%c0_10, %c0_11] : memref<1x32xf32, #tpu.memory_space<vmem>>, vector<1x32xf32>
    %13 = vector.broadcast %12 : vector<1x32xf32> to vector<8x32xf32>
    %14 = arith.addf %11, %13 : vector<8x32xf32>
    %c0_12 = arith.constant 0 : index
    %c0_13 = arith.constant 0 : index
    %15 = vector.load %arg14[%c0_12, %c0_13] : memref<32x32xf32, #tpu.memory_space<vmem>>, vector<32x32xf32>
    %16 = tpu.transpose %9, [1, 0] : vector<8x32xf32> -> vector<32x8xf32>
    %cst_14 = arith.constant dense<0.000000e+00> : vector<32x32xf32>
    %17 = tpu.matmul %16, %14, %cst_14 {dimension_numbers = #tpu.dot_dimension_numbers<[1], [0], [0], [1], [0, 0, 1, 1], [], []>} : vector<32x8xf32>, vector<8x32xf32>, vector<32x32xf32> -> vector<32x32xf32>
    %18 = arith.addf %15, %17 : vector<32x32xf32>
    %c0_15 = arith.constant 0 : index
    %c0_16 = arith.constant 0 : index
    %19 = vector.load %arg14[%c0_15, %c0_16] : memref<32x32xf32, #tpu.memory_space<vmem>>, vector<32x32xf32>
    tpu.vector_store %arg14[%c0_15, %c0_16], %18 {strides = array<i32>} : memref<32x32xf32, #tpu.memory_space<vmem>>, vector<32x32xf32>,
    %c0_i32_17 = arith.constant 0 : i32
    %20 = arith.cmpi eq, %arg1, %c0_i32_17 : i32
    %21 = arith.extui %20 : i1 to i32
    %c0_i32_18 = arith.constant 0 : i32
    %22 = arith.cmpi ne, %21, %c0_i32_18 : i32
    scf.if %22 {
      %c0_19 = arith.constant 0 : index
      %c0_20 = arith.constant 0 : index
      %23 = vector.load %arg14[%c0_19, %c0_20] : memref<32x32xf32, #tpu.memory_space<vmem>>, vector<32x32xf32>
      %c0_21 = arith.constant 0 : index
      %c0_22 = arith.constant 0 : index
      %24 = vector.load %arg9[%c0_21, %c0_22] : memref<32x32xf32, #tpu.memory_space<vmem>>, vector<32x32xf32>
      %25 = arith.mulf %23, %24 : vector<32x32xf32>
      %c0_23 = arith.constant 0 : index
      %c0_24 = arith.constant 0 : index
      %26 = vector.load %arg10[%c0_23, %c0_24] : memref<32x32xf32, #tpu.memory_space<vmem>>, vector<32x32xf32>
      %cst_25 = arith.constant dense<0.000000e+00> : vector<32x32xf32>
      %27 = tpu.matmul %25, %26, %cst_25 {dimension_numbers = #tpu.dot_dimension_numbers<[1], [0], [0], [1], [0, 0, 1, 1], [], []>} : vector<32x32xf32>, vector<32x32xf32>, vector<32x32xf32> -> vector<32x32xf32>
      %c0_26 = arith.constant 0 : index
      %c0_27 = arith.constant 0 : index
      %28 = vector.load %arg7[%c0_26, %c0_27] : memref<32x32xf32, #tpu.memory_space<vmem>>, vector<32x32xf32>
      %cst_28 = arith.constant dense<0.000000e+00> : vector<32x32xf32>
      %29 = tpu.matmul %28, %27, %cst_28 {dimension_numbers = #tpu.dot_dimension_numbers<[1], [0], [0], [1], [0, 0, 1, 1], [], []>} : vector<32x32xf32>, vector<32x32xf32>, vector<32x32xf32> -> vector<32x32xf32>
      %c0_29 = arith.constant 0 : index
      %c0_30 = arith.constant 0 : index
      %30 = vector.load %arg8[%c0_29, %c0_30] : memref<1x32xf32, #tpu.memory_space<vmem>>, vector<1x32xf32>
      %cst_31 = arith.constant dense<0.000000e+00> : vector<1x32xf32>
      %31 = tpu.matmul %30, %27, %cst_31 {dimension_numbers = #tpu.dot_dimension_numbers<[1], [0], [0], [1], [0, 0, 1, 1], [], []>} : vector<1x32xf32>, vector<32x32xf32>, vector<1x32xf32> -> vector<1x32xf32>
      %c0_32 = arith.constant 0 : index
      %c0_33 = arith.constant 0 : index
      %32 = vector.load %arg11[%c0_32, %c0_33] : memref<1x32xf32, #tpu.memory_space<vmem>>, vector<1x32xf32>
      %33 = arith.addf %31, %32 : vector<1x32xf32>
      %c0_34 = arith.constant 0 : index
      %c0_35 = arith.constant 0 : index
      %c0_36 = arith.constant 0 : index
      %34 = vector.load %arg12[%c0_34, %c0_35, %c0_36] : memref<1x32x32xf32, #tpu.memory_space<vmem>>, vector<1x32x32xf32>
      %35 = vector.shape_cast %34 : vector<1x32x32xf32> to vector<32x32xf32>
      %36 = vector.shape_cast %29 : vector<32x32xf32> to vector<1x32x32xf32>
      tpu.vector_store %arg12[%c0_34, %c0_35, %c0_36], %36 {strides = array<i32>} : memref<1x32x32xf32, #tpu.memory_space<vmem>>, vector<1x32x32xf32>,
      %c0_37 = arith.constant 0 : index
      %c0_38 = arith.constant 0 : index
      %c0_39 = arith.constant 0 : index
      %37 = vector.load %arg13[%c0_37, %c0_38, %c0_39] : memref<1x1x32xf32, #tpu.memory_space<vmem>>, vector<1x1x32xf32>
      %38 = vector.shape_cast %37 : vector<1x1x32xf32> to vector<1x32xf32>
      %39 = vector.shape_cast %33 : vector<1x32xf32> to vector<1x1x32xf32>
      tpu.vector_store %arg13[%c0_37, %c0_38, %c0_39], %39 {strides = array<i32>} : memref<1x1x32xf32, #tpu.memory_space<vmem>>, vector<1x1x32xf32>,
    } else {
    }
    return
  }
  func.func @transform_0(%arg0: i32, %arg1: i32) -> (i32, i32, i32) {
    %c0_i32 = arith.constant 0 : i32
    %c0_i32_0 = arith.constant 0 : i32
    return %arg0, %arg1, %c0_i32 : i32, i32, i32
  }
  func.func @transform_1(%arg0: i32, %arg1: i32) -> (i32, i32) {
    %c0_i32 = arith.constant 0 : i32
    %c0_i32_0 = arith.constant 0 : i32
    %c0_i32_1 = arith.constant 0 : i32
    return %c0_i32, %c0_i32_0 : i32, i32
  }
  func.func @transform_2(%arg0: i32, %arg1: i32) -> (i32, i32) {
    %c0_i32 = arith.constant 0 : i32
    %c0_i32_0 = arith.constant 0 : i32
    %c0_i32_1 = arith.constant 0 : i32
    return %c0_i32, %c0_i32_0 : i32, i32
  }
  func.func @transform_3(%arg0: i32, %arg1: i32) -> (i32, i32) {
    %c0_i32 = arith.constant 0 : i32
    %c0_i32_0 = arith.constant 0 : i32
    %c0_i32_1 = arith.constant 0 : i32
    return %c0_i32, %c0_i32_0 : i32, i32
  }
  func.func @transform_4(%arg0: i32, %arg1: i32) -> (i32, i32) {
    %c0_i32 = arith.constant 0 : i32
    %c0_i32_0 = arith.constant 0 : i32
    %c0_i32_1 = arith.constant 0 : i32
    return %c0_i32, %c0_i32_0 : i32, i32
  }
  func.func @transform_5(%arg0: i32, %arg1: i32) -> (i32, i32) {
    %c0_i32 = arith.constant 0 : i32
    %c0_i32_0 = arith.constant 0 : i32
    %c0_i32_1 = arith.constant 0 : i32
    return %c0_i32, %c0_i32_0 : i32, i32
  }
  func.func @transform_6(%arg0: i32, %arg1: i32) -> (i32, i32) {
    %c0_i32 = arith.constant 0 : i32
    %c0_i32_0 = arith.constant 0 : i32
    %c0_i32_1 = arith.constant 0 : i32
    return %c0_i32, %c0_i32_0 : i32, i32
  }
  func.func @transform_7(%arg0: i32, %arg1: i32) -> (i32, i32) {
    %c0_i32 = arith.constant 0 : i32
    %c0_i32_0 = arith.constant 0 : i32
    %c0_i32_1 = arith.constant 0 : i32
    return %c0_i32, %c0_i32_0 : i32, i32
  }
  func.func @transform_8(%arg0: i32, %arg1: i32) -> (i32, i32) {
    %c0_i32 = arith.constant 0 : i32
    %c0_i32_0 = arith.constant 0 : i32
    %c0_i32_1 = arith.constant 0 : i32
    return %c0_i32, %c0_i32_0 : i32, i32
  }
  func.func @transform_9(%arg0: i32, %arg1: i32) -> (i32, i32) {
    %c0_i32 = arith.constant 0 : i32
    %c0_i32_0 = arith.constant 0 : i32
    %c0_i32_1 = arith.constant 0 : i32
    return %c0_i32, %c0_i32_0 : i32, i32
  }
  func.func @transform_10(%arg0: i32, %arg1: i32) -> (i32, i32, i32) {
    %c0_i32 = arith.constant 0 : i32
    %c0_i32_0 = arith.constant 0 : i32
    %c0_i32_1 = arith.constant 0 : i32
    return %arg0, %c0_i32, %c0_i32_0 : i32, i32, i32
  }
  func.func @transform_11(%arg0: i32, %arg1: i32) -> (i32, i32, i32) {
    %c0_i32 = arith.constant 0 : i32
    %c0_i32_0 = arith.constant 0 : i32
    %c0_i32_1 = arith.constant 0 : i32
    return %arg0, %c0_i32, %c0_i32_0 : i32, i32, i32
  }
}

</mosaic_0001>

<bundles_post_ra>
// kernel: tpu_custom_call.1
= control target key start
LH: loop header
LB: loop body
LE: loop exit
PB: predicated region body
PF: predicated region fallthrough
CT: control target
= control target key end

     0   :  { %s2412_s0 = inlined_call_operand.hbm [shape: f32[2,8,32], index: 0, kind: input, shape index: {}]   ;;  %s2413_s1 = inlined_call_operand.hbm [shape: f32[32,32], index: 1, kind: input, shape index: {}]   ;;  %s2414_s2 = inlined_call_operand.vmem [shape: f32[1,32], index: 2, kind: input, shape index: {}]   ;;  %s2415_s3 = inlined_call_operand.hbm [shape: f32[32,32], index: 3, kind: input, shape index: {}]   ;;  %s2416_s4 = inlined_call_operand.vmem [shape: f32[1,32], index: 4, kind: input, shape index: {}]   ;;  %s2417_s5 = inlined_call_operand.hbm [shape: f32[32,32], index: 5, kind: input, shape index: {}]   ;;  %s2418_s6 = inlined_call_operand.vmem [shape: f32[1,32], index: 6, kind: input, shape index: {}]   ;;  %s2419_s7 = inlined_call_operand.hbm [shape: f32[32,32], index: 7, kind: input, shape index: {}]   ;;  %s2420_s8 = inlined_call_operand.hbm [shape: f32[32,32], index: 8, kind: input, shape index: {}]   ;;  %s2421_s9 = inlined_call_operand.vmem [shape: f32[1,32], index: 9, kind: input, shape index: {}]   ;;  %s2422_s10 = inlined_call_operand.hbm [shape: f32[2,32,32], index: 10, kind: output, shape index: {0}]   ;;  %s2423_s11 = inlined_call_operand.hbm [shape: f32[2,1,32], index: 11, kind: output, shape index: {1}]  }
   0x1   :  { %2432 = sst [smem:[#allocation24_spill]] %s2412_s0 }
   0x2   :  { %2433 = sst [smem:[#allocation25_spill]] %s2413_s1 }
   0x3   :  { %2434 = sst [smem:[#allocation26_spill]] %s2414_s2 }
   0x4   :  { %2435 = sst [smem:[#allocation27_spill]] %s2418_s6 }
   0x5   :  { %2436 = sst [smem:[#allocation28_spill]] %s2421_s9 }
   0x6   :  { %2437 = sst [smem:[#allocation29_spill]] %s2422_s10 }
   0x7   :  { %2438 = sst [smem:[#allocation30_spill]] %s2423_s11 }
   0x8   :  { %17 = vsyncpa [#allocation4], 0 }
   0x9   :  { %19 = vsyncpa [#allocation4 + $0x1], 0 }
   0xa   :  { %20 = vsyncpa [#allocation7], 0 }
   0xb   :  { %21 = vsyncpa [#allocation10], 0 }
   0xc   :  { %22 = vsyncpa [#allocation13], 0 }
   0xd   :  { %23 = vsyncpa [#allocation5], 0 }
   0xe   :  { %25 = vsyncpa [#allocation5 + $0x1], 0 }
   0xf   :  { %26 = vsyncpa [#allocation16], 0 }
  0x10   :  { %28 = vsyncpa [#allocation16 + $0x1], 0  ;;  %s1985_s17 = smov 0   ;;  %s1987_s18 = smov 0  }
  0x11   :  { %s1989_s19 = smov 0   ;;  %s1991_s20 = smov 0  }
  0x12   :  { %s1993_s21 = smov 0   ;;  %s1995_s22 = smov 0  }
  0x13 LB: > { %2439 = sst [smem:[#allocation23_spill]] %s1900_s20  ;;  %s2424_s23 = sadd.s32 4294967295, %s1908_s22   ;;  %s1908_s22 = sphi %s1995_s22, %s34_s22   ;;  %s1904_s21 = sphi %s1993_s21, %s2468_s21   ;;  %s1900_s20 = sphi %s1991_s20, %s2467_s20   ;;  %s1896_s19 = sphi %s1989_s19, %s2466_s19   ;;  %s1892_s18 = sphi %s1987_s18, %s2465_s18   ;;  %s1888_s17 = sphi %s1985_s17, %s2464_s17  }
  0x14   : > { %p1307_p0 = scmp.ge.s32.totalorder %s1908_s22, 1  ;;  %p2019_p1 = scmp.eq.s32.totalorder %s2424_s23, 0 }
  0x15   : > { %p320_p2 = scmp.lt.s32.totalorder %s1908_s22, 3  ;;  %s1910_s26 = smov [#allocation6]  }
  0x16   : > { %s2440_s24 = scalar_select %p2019_p1, 1, 0 }
  0x17   : > { %p2024_p3 = pnand %p1307_p0, %p320_p2  ;;  %s332_s27 = sshll.u32 %s1910_s26, 4  ;;  %s2028_s27 = int_to_ptr.vmem [resolvable:$true] %s332_s27 }
  0x18   : > { %s1911_s29 = smov [#allocation9]   ;;  %s1912_s12 = smov [#allocation8]  }
  0x19   : > { %s2441_s25 = scalar_select %p2024_p3, 1, 0 }
  0x1a   : > { %p1513_p4 = pneg %p2024_p3  ;;  %s364_s30 = sshll.u32 %s1911_s29, 4  ;;  %s2039_s30 = int_to_ptr.vmem [resolvable:$true] %s364_s30 }
  0x1b   : > { %s2041_s13 = sshll.u32 %s1912_s12, 4  ;;  %s2443_s1 = sld [smem:[#allocation25_spill]]  ;;  %s349_s13 = int_to_ptr.vmem [resolvable:$true] %s2041_s13 }
  0x1c   : > { %p2035_p6 = pnand %p1513_p4, %p2019_p1 }
  0x1e   : > { %p2051_p8 = pneg %p2035_p6 }
  0x21   : > { %s1612_s16 = scalar_lea.hbm %s2443_s1, 512 }
  0x22   : > { %p1613_p7 = scmp.ne.s32.totalorder %s2443_s1, %s1612_s16  ;;  %p1619_p11 = scmp.lt.u32.totalorder %s1612_s16, %s2443_s1 }
  0x24   : > { %p1615_p9 = pnand %p2051_p8, %p1613_p7 }
  0x26   : > { %p1616_p10 = pneg %p1615_p9 }
  0x28   : > { %p1621_p12 = pnand %p1619_p11, %p1616_p10 }
  0x2a   : > { %1624 = shalt.err (!%p1621_p12)
}
  0x2b   : > { %s1625_s23 = scalar_lea.vmem %s2028_s27, 512  ;;  %p1633_p4 = scmp.lt.s32.totalorder %s2028_s27, %s2028_s27 }
  0x2c   : > { %p1626_p13 = scmp.ne.s32.totalorder %s2028_s27, %s1625_s23  ;;  %p1634_p5 = scmp.lt.s32.totalorder %s1625_s23, %s1625_s23 }
  0x2e   : > { %p1628_p0 = pnand %p1626_p13, %p2051_p8  ;;  %p1635_p7 = por %p1634_p5, %p1633_p4 }
  0x30   : > { %p1629_p2 = pneg %p1628_p0 }
  0x32   : > { %p1636_p9 = pnand %p1635_p7, %p1629_p2 }
  0x34   : > { %1639 = shalt.err (!%p1636_p9)
}
  0x35   : > { %s1913_s14 = smov 128   ;;  %s1914_s15 = smov 8  }
  0x36   : > { %1516 = dma.hbm_to_vmem [thread:$0]  (!%p2035_p6), %s2443_s1, 512, %s2028_s27, [#allocation7], %s1913_s14, %s1913_s14, %s1914_s15  }
  0x37   : > { %s1640_s23 = scalar_lea.hbm %s2417_s5, 512 }
  0x38   : > { %p1641_p5 = scmp.ne.s32.totalorder %s2417_s5, %s1640_s23  ;;  %p1647_p12 = scmp.lt.u32.totalorder %s1640_s23, %s2417_s5 }
  0x3a   : > { %p1643_p10 = pnand %p1641_p5, %p2051_p8 }
  0x3c   : > { %p1644_p11 = pneg %p1643_p10 }
  0x3e   : > { %p1649_p13 = pnand %p1647_p12, %p1644_p11 }
  0x40   : > { %1652 = shalt.err (!%p1649_p13)
}
  0x41   : > { %s1653_s27 = scalar_lea.vmem %s2039_s30, 512  ;;  %p1661_p7 = scmp.lt.s32.totalorder %s2039_s30, %s2039_s30 }
  0x42   : > { %p1654_p0 = scmp.ne.s32.totalorder %s2039_s30, %s1653_s27  ;;  %p1662_p9 = scmp.lt.s32.totalorder %s1653_s27, %s1653_s27 }
  0x44   : > { %p1656_p2 = pnand %p1654_p0, %p2051_p8  ;;  %p1663_p5 = por %p1662_p9, %p1661_p7 }
  0x46   : > { %p1657_p4 = pneg %p1656_p2 }
  0x48   : > { %p1664_p10 = pnand %p1663_p5, %p1657_p4 }
  0x4a   : > { %1667 = shalt.err (!%p1664_p10)
}
  0x4b   : > { %1522 = dma.hbm_to_vmem [thread:$0]  (!%p2035_p6), %s2417_s5, 512, %s2039_s30, [#allocation10], %s1913_s14, %s1913_s14, %s1914_s15  }
  0x4c   : > { %s1668_s16 = scalar_lea.hbm %s2415_s3, 512 }
  0x4d   : > { %p1669_p11 = scmp.ne.s32.totalorder %s2415_s3, %s1668_s16  ;;  %p1675_p0 = scmp.lt.u32.totalorder %s1668_s16, %s2415_s3 }
  0x4f   : > { %p1671_p12 = pnand %p1669_p11, %p2051_p8 }
  0x51   : > { %p1672_p13 = pneg %p1671_p12 }
  0x53   : > { %p1677_p2 = pnand %p1675_p0, %p1672_p13 }
  0x55   : > { %1680 = shalt.err (!%p1677_p2)
}
  0x56   : > { %s1681_s27 = scalar_lea.vmem %s349_s13, 512  ;;  %p1689_p5 = scmp.lt.s32.totalorder %s349_s13, %s349_s13 }
  0x57   : > { %p1682_p4 = scmp.ne.s32.totalorder %s349_s13, %s1681_s27  ;;  %p1690_p10 = scmp.lt.s32.totalorder %s1681_s27, %s1681_s27 }
  0x59   : > { %p1684_p7 = pnand %p1682_p4, %p2051_p8  ;;  %p1691_p3 = por %p1690_p10, %p1689_p5 }
  0x5b   : > { %p1685_p9 = pneg %p1684_p7 }
  0x5d   : > { %p1692_p1 = pnand %p1691_p3, %p1685_p9 }
  0x5f   : > { %1695 = shalt.err (!%p1692_p1)
}
  0x60   : > { %1519 = dma.hbm_to_vmem [thread:$0]  (!%p2035_p6), %s2415_s3, 512, %s349_s13, [#allocation7], %s1913_s14, %s1913_s14, %s1914_s15  }
  0x61   : > { %s1915_s9 = smov [#allocation11]   ;;  %s1916_s20 = smov [#allocation12]  }
  0x62   : > { %s380_s11 = sshll.u32 %s1915_s9, 4  ;;  %s393_s16 = sshll.u32 %s1916_s20, 4  ;;  %s381_s11 = int_to_ptr.vmem [resolvable:$true] %s380_s11  ;;  %s394_s16 = int_to_ptr.vmem [resolvable:$true] %s393_s16 }
  0x63   : > { %s1696_s12 = scalar_lea.hbm %s2419_s7, 512 }
  0x64   : > { %p1697_p1 = scmp.ne.s32.totalorder %s2419_s7, %s1696_s12  ;;  %p1703_p12 = scmp.lt.u32.totalorder %s1696_s12, %s2419_s7 }
  0x66   : > { %p1699_p3 = pnand %p1697_p1, %p2051_p8 }
  0x68   : > { %p1700_p11 = pneg %p1699_p3 }
  0x6a   : > { %p1705_p13 = pnand %p1703_p12, %p1700_p11 }
  0x6c   : > { %1708 = shalt.err (!%p1705_p13)
}
  0x6d   : > { %s1709_s13 = scalar_lea.vmem %s381_s11, 512  ;;  %p1717_p7 = scmp.lt.s32.totalorder %s381_s11, %s381_s11 }
  0x6e   : > { %p1710_p0 = scmp.ne.s32.totalorder %s381_s11, %s1709_s13  ;;  %p1718_p9 = scmp.lt.s32.totalorder %s1709_s13, %s1709_s13 }
  0x70   : > { %p1712_p2 = pnand %p1710_p0, %p2051_p8  ;;  %p1719_p5 = por %p1718_p9, %p1717_p7 }
  0x72   : > { %p1713_p4 = pneg %p1712_p2 }
  0x74   : > { %p1720_p10 = pnand %p1719_p5, %p1713_p4 }
  0x76   : > { %1723 = shalt.err (!%p1720_p10)
}
  0x77   : > { %1525 = dma.hbm_to_vmem [thread:$0]  (!%p2035_p6), %s2419_s7, 512, %s381_s11, [#allocation10], %s1913_s14, %s1913_s14, %s1914_s15  }
  0x78   : > { %s1724_s26 = scalar_lea.hbm %s2420_s8, 512 }
  0x79   : > { %p1725_p1 = scmp.ne.s32.totalorder %s2420_s8, %s1724_s26  ;;  %p1731_p12 = scmp.lt.u32.totalorder %s1724_s26, %s2420_s8 }
  0x7b   : > { %p1727_p3 = pnand %p1725_p1, %p2051_p8 }
  0x7d   : > { %p1728_p11 = pneg %p1727_p3 }
  0x7f   : > { %p1733_p13 = pnand %p1731_p12, %p1728_p11 }
  0x81   : > { %1736 = shalt.err (!%p1733_p13)
}
  0x82   : > { %s1737_s30 = scalar_lea.vmem %s394_s16, 512  ;;  %p1745_p7 = scmp.lt.s32.totalorder %s394_s16, %s394_s16 }
  0x83   : > { %p1738_p0 = scmp.ne.s32.totalorder %s394_s16, %s1737_s30  ;;  %p1746_p9 = scmp.lt.s32.totalorder %s1737_s30, %s1737_s30 }
  0x85   : > { %p1740_p2 = pnand %p1738_p0, %p2051_p8  ;;  %p1747_p5 = por %p1746_p9, %p1745_p7 }
  0x87   : > { %p1741_p4 = pneg %p1740_p2 }
  0x89   : > { %p1748_p10 = pnand %p1747_p5, %p1741_p4 }
  0x8b   : > { %1751 = shalt.err (!%p1748_p10)
}
  0x8c   : > { %1528 = dma.hbm_to_vmem [thread:$0]  (!%p2035_p6), %s2420_s8, 512, %s394_s16, [#allocation13], %s1913_s14, %s1913_s14, %s1914_s15  }
  0x8d   : > { %s1306_s10 = sadd.s32 4294967294, %s1908_s22   ;;  %s46_s28 = sadd.s32 1, %s1904_s21 }
  0x8e   : > { %s55_s1 = sadd.s32 1, %s1896_s19  ;;  %p48_p8 = scmp.ge.s32.totalorder %s46_s28, 2 }
  0x8f   : > { %p62_p1 = scmp.ne.s32.totalorder %s1896_s19, %s1892_s18  ;;  %p63_p3 = scmp.eq.s32.totalorder %s1908_s22, 0 }
  0x90   : > { %p68_p11 = scmp.ne.s32.totalorder %s1892_s18, %s1888_s17  ;;  %s2470_s28 = smov (%p48_p8, %s46_s28), 0 }
  0x91   : > { %p2175_p12 = por %p63_p3, %p62_p1  ;;  %p2446_p13 = scmp.ne.s32.totalorder %s2440_s24, 0 }
  0x92   : > { %s50_s15 = ssub.s32 %s1904_s21, %s2470_s28  ;;  %s2448_s16 = sadd.s32 4294967295, %s1908_s22  }
  0x93   : > { %p2181_p6 = por %p2446_p13, %p68_p11  ;;  %p281_p0 = scmp.eq.s32.totalorder %s2448_s16, 1 }
  0x94   : > { %p53_p2 = scmp.eq.s32.totalorder %s50_s15, 0  ;;  %p287_p4 = scmp.eq.s32.totalorder %s1306_s10, 1 }
  0x95   : > { %p2189_p7 = por %p281_p0, %p62_p1  ;;  %p1545_p9 = scmp.lt.s32.totalorder %s1908_s22, 2 }
  0x96   : > { %s2195_s20 = scalar_select %p53_p2, %s1896_s19, %s55_s1  }
  0x97   : > { %s2449_s9 = scalar_select %p2189_p7, 1, 0 }
  0x98   : > { %p2197_p5 = por %p287_p4, %p68_p11  ;;  %s410_s29 = sand.u32 1, %s1896_s19  }
  0x99   : > { %s1314_s12 = sshll.u32 %s410_s29, 3  ;;  %s1315_s23 = sshll.u32 %s1904_s21, 7 }
  0x9a   : > { %s2450_s26 = scalar_select %p2197_p5, 1, 0 }
  0x9b   : > { %s2451_s0 = sld [smem:[#allocation24_spill]]  ;;  %s414_s13 = scalar_lea.vmem [#allocation3], %s1314_s12 }
  0x9c   : > { %s422_s10 = sshll.u32 %s414_s13, 4  ;;  %p2212_p10 = pnand %p1545_p9, %p2175_p12  ;;  %s2208_s10 = int_to_ptr.vmem [resolvable:$true] %s422_s10 }
  0x9d   : > { %s411_s15 = scalar_lea.sflag [#allocation4], %s410_s29 }
  0x9e   : > { %p1754_p1 = pneg %p2212_p10 }
  0xa1   : > { %s2206_s11 = scalar_lea.hbm %s2451_s0, %s1315_s23  ;;  %s1757_s27 = scalar_lea.hbm %s2451_s0, 256 }
  0xa2   : > { %s1752_s16 = scalar_lea.hbm %s2206_s11, 128  ;;  %p1758_p12 = scmp.lt.u32.totalorder %s2206_s11, %s2451_s0 }
  0xa3   : > { %p1753_p8 = scmp.ne.s32.totalorder %s2206_s11, %s1752_s16  ;;  %p1759_p13 = scmp.lt.u32.totalorder %s1757_s27, %s1752_s16 }
  0xa4   : > { %p1761_p2 = scmp.lt.u32.totalorder %s1752_s16, %s2206_s11 }
  0xa5   : > { %p1755_p3 = pnand %p1754_p1, %p1753_p8  ;;  %p1760_p0 = por %p1759_p13, %p1758_p12 }
  0xa7   : > { %p1756_p11 = pneg %p1755_p3  ;;  %p1762_p4 = por %p1761_p2, %p1760_p0 }
  0xa9   : > { %p1763_p9 = pnand %p1762_p4, %p1756_p11 }
  0xab   : > { %1766 = shalt.err (!%p1763_p9)
}
  0xac   : > { %s1767_s29 = scalar_lea.vmem %s2208_s10, 128  ;;  %s1917_s13 = smov [#allocation3]  }
  0xad   : > { %p1768_p8 = scmp.ne.s32.totalorder %s2208_s10, %s1767_s29  ;;  %s1772_s12 = sshll.u32 %s1917_s13, 4  ;;  %s1773_s12 = int_to_ptr.vmem [resolvable:$false] %s1772_s12 }
  0xae   : > { %s1774_s23 = scalar_lea.vmem %s1773_s12, 256  ;;  %p1775_p7 = scmp.lt.s32.totalorder %s2208_s10, %s1773_s12 }
  0xaf   : > { %p1770_p3 = pnand %p1768_p8, %p1754_p1  ;;  %p1776_p12 = scmp.lt.s32.totalorder %s1774_s23, %s1767_s29 }
  0xb1   : > { %p1771_p5 = pneg %p1770_p3  ;;  %p1777_p13 = por %p1776_p12, %p1775_p7 }
  0xb3   : > { %p1778_p0 = pnand %p1777_p13, %p1771_p5 }
  0xb5   : > { %1781 = shalt.err (!%p1778_p0)
}
  0xb6   : > { %1532 = dma.hbm_to_vmem [thread:$0]  (!%p2212_p10), %s2206_s11, 128, %s2208_s10, %s411_s15  }
  0xb7   : > { %p2453_p11 = scmp.ne.s32.totalorder %s2441_s25, 0 }
  0xb8   : > { %s2244_s16 = sand.u32 (!%p2453_p11), 1, %s1892_s18  }
  0xb9   : > { %431 = sbr.rel (%p2453_p11) target bundleno = 1263 (0x4ef), region = 60  ;;  %s1317_s27 = sshll.u32 (!%p2453_p11), %s2244_s16, 3 }
  0xba   : > { %s434_s6 = scalar_lea.sflag (!%p2453_p11), [#allocation4], %s2244_s16  ;;  %s2248_s30 = scalar_lea.vmem (!%p2453_p11), [#allocation3], %s1317_s27 }
  0xc0   : > { %1863 = dma.done.wait (%p2181_p6), %s434_s6, 128  }
  0xc1   : > { %1865 = vsyncadd (%p2181_p6), %s434_s6, 4294967168  ;;  %p2454_p7 = scmp.ne.s32.totalorder %s2440_s24, 0 }
  0xc3   : > { %1867 = dma.done.wait (%p2454_p7), [#allocation7], 1024  }
  0xc4   : > { %1869 = vsyncadd (%p2454_p7), [#allocation7], 4294966272 }
  0xc5   : > { %1871 = dma.done.wait (%p2454_p7), [#allocation10], 1024  }
  0xc6   : > { %1873 = vsyncadd (%p2454_p7), [#allocation10], 4294966272 }
  0xc7   : > { %1875 = dma.done.wait (%p2454_p7), [#allocation13], 512  }
  0xc8   : > { %1877 = vsyncadd (%p2454_p7), [#allocation13], 4294966784  ;;  %vm504_vm0 = vcmask 261120   ;;  %v1918_v0 = vmov 0.0|0.0   ;;  %vm1919_vm1 = vmmov 0   ;;  %v1920_v1 = vmov 0.0  }
  0xc9   : > { %1453 = vmatprep.subr.bf16.mxu0 %v1918_v0  ;;  %1392 = vmatprep.mubr.msk.f32.mxu0 %vm1919_vm1, %v1920_v1  ;;  %505 = vst.msk [vmem:[#allocation2] sm:$0xff] %vm504_vm0, %v1920_v1  ;;  %506 = vst.msk [vmem:[#allocation2 + $0x8] sm:$0xff] %vm504_vm0, %v1920_v1  ;;  %v510_v2 = vld [vmem:[#allocation6] sm:$0xff]  ;;  %v511_v3 = vld [vmem:[#allocation6 + $0x8] sm:$0xff]  ;;  %s2455_s2 = sld [smem:[#allocation26_spill]]  ;;  %vm712_vm2 = vcmask 64512  }
  0xca   : > { %507 = vst.msk [vmem:[#allocation2 + $0x10] sm:$0xff] %vm504_vm0, %v1920_v1  ;;  %508 = vst.msk [vmem:[#allocation2 + $0x18] sm:$0xff] %vm504_vm0, %v1920_v1  ;;  %1459 = vmatprep.subr.bf16.mxu1 %v1918_v0  ;;  %1403 = vmatprep.mubr.msk.f32.mxu1 %vm1919_vm1, %v1920_v1  ;;  %v512_v4 = vld [vmem:[#allocation6 + $0x10] sm:$0xff]  ;;  %v1454_v5 = vpack.c.bf16 %v511_v3, %v510_v2  ;;  %v513_v6 = vld [vmem:[#allocation6 + $0x18] sm:$0xff]  ;;  %s2456_s10 = sld [smem:[#allocation23_spill]]  ;;  %s2457_s29 = sld [smem:[#allocation27_spill]] }
  0xcb   : > { %v595_v7 = vld [vmem:[#allocation8] sm:$0xff]  ;;  %v596_v8 = vld [vmem:[#allocation8 + $0x8] sm:$0xff]  ;;  %v597_v9 = vld [vmem:[#allocation8 + $0x10] sm:$0xff]  ;;  %v1457_v11 = vpack.c.bf16 %v513_v6, %v512_v4  ;;  %s1323_s13 = sshll.u32 %s2244_s16, 5  ;;  %s2458_s27 = sld [smem:[#allocation28_spill]]  ;;  %vm1114_vm3 = vcmask 253952  }
  0xcc   : > { %v598_v10 = vld [vmem:[#allocation8 + $0x18] sm:$0xff]  ;;  %1455 = vmatpush3.bf16.msra.mxu0 %v1454_v5  ;;  %v1460_v12 = vpack.c.bf16 %v596_v8, %v595_v7  ;;  %v1326_v17 = vld [vmem:[%s2416_s4] ss:$0 sm:$0xff]  ;;  %v833_v27 = vld [vmem:[#allocation12] sm:$0xff]  ;;  %s2317_s25 = scalar_lea.vmem [#allocation14], %s1323_s13  ;;  %s2460_s23 = sld [smem:[#allocation29_spill]] }
  0xcd   : > { %1456 = vmatprep.subr.bf16.mxu0 %v1918_v0  ;;  %v1463_v13 = vpack.c.bf16 %v598_v10, %v597_v9  ;;  %v509_v14 = vld [vmem:[%s2248_s30] sm:$0xff]  ;;  %v834_v28 = vld [vmem:[#allocation12 + $0x8] sm:$0xff]  ;;  %v825_v44 = vld [vmem:[#allocation11] sm:$0xff]  ;;  %s499_s30 = scalar_lea.vmem [#allocation15], %s2244_s16  ;;  %s1134_s14 = sshll.u32 %s2317_s25, 4  ;;  %s2330_s14 = int_to_ptr.vmem [resolvable:$true] %s1134_s14 }
  0xce   : > { %1461 = vmatpush3.bf16.msra.mxu1 %v1460_v12  ;;  %v1465_v29 = vpack.c.bf16 %v834_v28, %v833_v27  ;;  %v835_v30 = vld [vmem:[#allocation12 + $0x10] sm:$0xff]  ;;  %v836_v31 = vld [vmem:[#allocation12 + $0x18] sm:$0xff]  ;;  %v826_v47 = vld [vmem:[#allocation11 + $0x8] sm:$0xff]  ;;  %s1150_s24 = sshll.u32 %s499_s30, 4  ;;  %p2461_p5 = scmp.ne.s32.totalorder %s2449_s9, 0  ;;  %s2326_s24 = int_to_ptr.vmem [resolvable:$true] %s1150_s24 }
  0xcf   : > { %1462 = vmatprep.subr.bf16.mxu1 %v1918_v0  ;;  %v1324_v15 = vld [vmem:[%s2455_s2] ss:$0 sm:$0xff]  ;;  %v1469_v32 = vpack.c.bf16 %v836_v31, %v835_v30  ;;  %v828_v53 = vld [vmem:[#allocation11 + $0x18] sm:$0xff]  ;;  %v934_v57 = vld [vmem:[#allocation9] sm:$0xff]  ;;  %s1782_s1 = scalar_lea.vmem %s2326_s24, 16  ;;  %s1921_s15 = smov [#allocation15]  }
  0xd0   : > { %1458 = vmatpush3.bf16.msra.mxu0 %v1457_v11  ;;  %v677_v33 = vld [vmem:[#allocation2 + $0x8] sm:$0xff]  ;;  %v676_v34 = vld [vmem:[#allocation2] sm:$0xff]  ;;  %v935_v2 = vld [vmem:[#allocation9 + $0x8] sm:$0xff]  ;;  %s1344_s6 = sshll.u32 %s2456_s10, 4  ;;  %s1347_s11 = sshll.u32 %s2456_s10, 9 }
  0xd1   : > { %v679_v39 = vld [vmem:[#allocation2 + $0x18] sm:$0xff]  ;;  %v678_v40 = vld [vmem:[#allocation2 + $0x10] sm:$0xff]  ;;  %v827_v51 = vld [vmem:[#allocation11 + $0x10] sm:$0xff]  ;;  %p1783_p6 = scmp.ne.s32.totalorder %s2326_s24, %s1782_s1  ;;  %s1786_s0 = sshll.u32 %s1921_s15, 4  ;;  %s1787_s0 = int_to_ptr.vmem [resolvable:$false] %s1786_s0 }
  0xd2   : > { %1464 = vmatpush3.bf16.msra.mxu1 %v1463_v13  ;;  %v936_v3 = vld [vmem:[#allocation9 + $0x10] sm:$0xff]  ;;  %s1788_s2 = scalar_lea.vmem %s1787_s0, 32  ;;  %p1789_p2 = scmp.lt.s32.totalorder %s2326_s24, %s1787_s0 }
  0xd3   : > { %1393 = vmatmul.mubr.msk.f32.vlgmr.msra.gmra.mrb[0].mxu0 %vm504_vm0, %v509_v14  ;;  %1466 = vmatprep.subr.bf16.mxu1 %v1465_v29  ;;  %v1036_v4 = vld [vmem:[%s2458_s27] sm:$0x1]  ;;  %s2337_s27 = scalar_lea.hbm %s2460_s23, %s1347_s11  ;;  %p1784_p10 = pnand %p1783_p6, %p2461_p5 }
  0xd4   : > { %p1790_p4 = scmp.lt.s32.totalorder %s1788_s2, %s1782_s1 }
  0xd5   : > { %1404 = vmatmul.mubr.msk.f32.vlgmr.msra.gmra.mrb[0].mxu1 %vm504_vm0, %v509_v14  ;;  %p1785_p1 = pneg %p1784_p10 }
  0xd6   : > { %1468 = vmatpush3.bf16.msra.mxu1 %v1465_v29  ;;  %p1791_p9 = por %p1790_p4, %p1789_p2 }
  0xd7   : > { %1470 = vmatprep.subr.bf16.mxu1 %v1469_v32 }
  0xd8   : > { %p1792_p8 = pnand %p1791_p9, %p1785_p1 }
  0xda   : > { %1472 = vmatpush3.bf16.msra.mxu1 %v1469_v32 }
  0xdb   : > { %1481 = vmatprep.subr.bf16.mxu1 %v1918_v0 }
 0x1a6   : > { %v591_v16 = vpop.f32.mrb[0].mxu0 }
 0x1a7   : > { %v1394_v18 = vpop.f32.mrb[1].mxu0  ;;  %v592_v19 = vadd.f32 %v1324_v15, %v591_v16 }
 0x1a8   : > { %v672_v20 = vpop.f32.mrb[0].mxu1 }
 0x1a9   : > { %680 = vxpose.xlu0.b32.start.end [1/1] (short) (narrow) %v592_v19, 32  ;;  %v673_v21 = vadd.f32 %v1326_v17, %v672_v20  ;;  %v1405_v22 = vpop.f32.mrb[1].mxu1 }
 0x1ab   : > { %1406 = vmatprep.subr.mxu0 %v673_v21 }
 0x1ac   : > { %1407 = vmatpush3.msra.mxu0 %v673_v21 }
 0x229   : > { %v696_v23 = vpop.trf.xlu0 }
 0x22a   : > { %1408 = vmatprep.mubr.msk.f32.mxu0 %vm712_vm2, %v696_v23 }
 0x22d   : > { %v697_v24 = vpop.trf.xlu0 }
 0x22e   : > { %1409 = vmatmul.mubr.msk.f32.vlgmr.msra.gmra.mrb[2].mxu0 %vm712_vm2, %v697_v24 }
 0x231   : > { %v698_v25 = vpop.trf.xlu0 }
 0x232   : > { %1411 = vmatprep.mubr.msk.f32.mxu0 %vm712_vm2, %v698_v25 }
 0x235   : > { %v699_v26 = vpop.trf.xlu0 }
 0x236   : > { %1412 = vmatmul.mubr.msk.f32.gmra.mrb[4].mxu0 %vm712_vm2, %v699_v26 }
 0x237   : > { %1436 = vmatprep.mubr.msk.f32.mxu0 %vm504_vm0, %v934_v57 }
 0x301   : > { %v1410_v35 = vpop.f32.mrb[2].mxu0 }
 0x302   : > { %v811_v36 = vadd.f32 %v1410_v35, %v677_v33  ;;  %v791_v37 = vpop.f32.mrb[3].mxu0 }
 0x303   : > { %v810_v38 = vadd.f32 %v791_v37, %v676_v34 }
 0x304   : > { %815 = vst.msk [vmem:[#allocation2 + $0x8] sm:$0xff] %vm504_vm0, %v811_v36 }
 0x305   : > { %814 = vst.msk [vmem:[#allocation2] sm:$0xff] %vm504_vm0, %v810_v38 }
 0x309   : > { %v1413_v41 = vpop.f32.mrb[4].mxu0 }
 0x30a   : > { %v813_v42 = vadd.f32 %v1413_v41, %v679_v39  ;;  %v801_v43 = vpop.f32.mrb[5].mxu0 }
 0x30b   : > { %v812_v45 = vadd.f32 %v801_v43, %v678_v40  ;;  %v822_v46 = vld [vmem:[#allocation2 + $0x8] sm:$0xff] }
 0x30c   : > { %817 = vst.msk [vmem:[#allocation2 + $0x18] sm:$0xff] %vm504_vm0, %v813_v42  ;;  %v821_v48 = vld [vmem:[#allocation2] sm:$0xff]  ;;  %v830_v50 = vmul.f32 %v826_v47, %v822_v46 }
 0x30d   : > { %816 = vst.msk [vmem:[#allocation2 + $0x10] sm:$0xff] %vm504_vm0, %v812_v45  ;;  %v829_v49 = vmul.f32 %v825_v44, %v821_v48 }
 0x30f   : > { %1422 = vmatprep.mubr.msk.f32.mxu1 %vm504_vm0, %v829_v49 }
 0x310   : > { %1423 = vmatmul.mubr.msk.f32.vlgmr.msra.gmra.mrb[2].mxu1 %vm504_vm0, %v830_v50 }
 0x313   : > { %v824_v52 = vld [vmem:[#allocation2 + $0x18] sm:$0xff] }
 0x314   : > { %v823_v54 = vld [vmem:[#allocation2 + $0x10] sm:$0xff]  ;;  %v832_v56 = vmul.f32 %v828_v53, %v824_v52 }
 0x315   : > { %v831_v55 = vmul.f32 %v827_v51, %v823_v54 }
 0x317   : > { %1425 = vmatprep.mubr.msk.f32.mxu1 %vm504_vm0, %v831_v55 }
 0x318   : > { %1426 = vmatmul.mubr.msk.f32.gmra.mrb[4].mxu1 %vm504_vm0, %v832_v56 }
 0x319   : > { %1450 = vmatprep.mubr.msk.f32.mxu1 %vm1919_vm1, %v1920_v1  ;;  %v1035_v1 = vld [vmem:[%s2457_s29] sm:$0x1]  ;;  %s2459_s29 = sld [smem:[#allocation30_spill]] }
 0x31f   : > { %s2324_s12 = scalar_lea.hbm %s2459_s29, %s1344_s6  ;;  %s1122_s6 = scalar_lea.sflag [#allocation16], %s2244_s16 }
 0x3e3   : > { %v1424_v58 = vpop.f32.mrb[2].mxu1 }
 0x3e4   : > { %v915_v59 = vpop.f32.mrb[3].mxu1 }
 0x3e5   : > { %v1473_v60 = vpack.c.bf16 %v1424_v58, %v915_v59 }
 0x3e7   : > { %1474 = vmatprep.subr.bf16.mxu0 %v1473_v60  ;;  %1483 = vmatpush3.bf16.msra.mxu1 %v1473_v60 }
 0x3e8   : > { %1476 = vmatpush3.bf16.msra.mxu0 %v1473_v60  ;;  %1484 = vmatprep.subr.bf16.mxu1 %v1918_v0  ;;  %v937_v0 = vld [vmem:[#allocation9 + $0x18] sm:$0xff] }
 0x3eb   : > { %v1427_v61 = vpop.f32.mrb[4].mxu1 }
 0x3ec   : > { %v925_v62 = vpop.f32.mrb[5].mxu1 }
 0x3ed   : > { %v1477_v63 = vpack.c.bf16 %v1427_v61, %v925_v62 }
 0x3ef   : > { %1478 = vmatprep.subr.bf16.mxu0 %v1477_v63  ;;  %1486 = vmatpush3.bf16.msra.mxu1 %v1477_v63 }
 0x3f0   : > { %1480 = vmatpush3.bf16.msra.mxu0 %v1477_v63 }
 0x3f2   : > { %1451 = vmatmul.mubr.msk.f32.vlgmr.msra.gmra.mrb[6].mxu1 %vm504_vm0, %v1035_v1 }
 0x3f3   : > { %1437 = vmatmul.mubr.msk.f32.vlgmr.msra.gmra.mrb[6].mxu0 %vm504_vm0, %v935_v2 }
 0x3f4   : > { %1439 = vmatprep.mubr.msk.f32.mxu0 %vm504_vm0, %v936_v3 }
 0x3f7   : > { %1440 = vmatmul.mubr.msk.f32.gmra.mrb[8].mxu0 %vm504_vm0, %v937_v0 }
 0x4c5   : > { %v1106_v5 = vpop.f32.mrb[6].mxu1 }
 0x4c6   : > { %v1438_v6 = vpop.f32.mrb[6].mxu0  ;;  %v1107_v7 = vadd.f32 %v1106_v5, %v1036_v4  ;;  %v1452_v8 = vpop.f32.mrb[7].mxu1 }
 0x4c7   : > { %1111 = vst.msk [vmem:[%s2317_s25 + $0x8] sm:$0xff] %vm504_vm0, %v1438_v6  ;;  %v1016_v9 = vpop.f32.mrb[7].mxu0 }
 0x4c8   : > { %1110 = vst.msk [vmem:[%s2317_s25] sm:$0xff] %vm504_vm0, %v1016_v9 }
 0x4c9   : > { %1115 = vst.msk [vmem:[%s499_s30] sm:$0x1] %vm1114_vm3, %v1107_v7 }
 0x4ca   : > { %1795 = shalt.err (!%p1792_p8)
}
 0x4cb   : > { %s1796_s30 = scalar_lea.hbm %s2324_s12, 16  ;;  %s1800_s13 = scalar_lea.hbm %s2459_s29, 32 }
 0x4cc   : > { %p1797_p3 = scmp.ne.s32.totalorder %s2324_s12, %s1796_s30  ;;  %p1801_p0 = scmp.lt.u32.totalorder %s2324_s12, %s2459_s29 }
 0x4cd   : > { %p1802_p11 = scmp.lt.u32.totalorder %s1800_s13, %s1796_s30  ;;  %p1804_p6 = scmp.lt.u32.totalorder %s1796_s30, %s2324_s12 }
 0x4ce   : > { %p1798_p12 = pnand %p1797_p3, %p2461_p5 }
 0x4cf   : > { %p1803_p7 = por %p1802_p11, %p1801_p0 }
 0x4d0   : > { %p1799_p13 = pneg %p1798_p12 }
 0x4d1   : > { %p1805_p10 = por %p1804_p6, %p1803_p7 }
 0x4d3   : > { %p1806_p1 = pnand %p1805_p10, %p1799_p13 }
 0x4d5   : > { %1809 = shalt.err (!%p1806_p1)
}
 0x4d6   : > { %1510 = dma.vmem_to_hbm [thread:$0]  (%p2461_p5), %s2326_s24, 16, %s2324_s12, %s1122_s6   ;;  %v1441_v10 = vpop.f32.mrb[8].mxu0 }
 0x4d7   : > { %1113 = vst.msk [vmem:[%s2317_s25 + $0x18] sm:$0xff] %vm504_vm0, %v1441_v10  ;;  %v1026_v11 = vpop.f32.mrb[9].mxu0  ;;  %s1117_s2 = scalar_lea.sflag [#allocation5], %s2244_s16  ;;  %s1810_s1 = scalar_lea.vmem %s2330_s14, 512 }
 0x4d8   : > { %1112 = vst.msk [vmem:[%s2317_s25 + $0x10] sm:$0xff] %vm504_vm0, %v1026_v11  ;;  %p1811_p2 = scmp.ne.s32.totalorder %s2330_s14, %s1810_s1  ;;  %s1922_s30 = smov [#allocation14]  }
 0x4d9   : > { %s1814_s11 = sshll.u32 %s1922_s30, 4  ;;  %s1815_s11 = int_to_ptr.vmem [resolvable:$false] %s1814_s11 }
 0x4da   : > { %p1812_p4 = pnand %p1811_p2, %p2461_p5  ;;  %s1816_s10 = scalar_lea.vmem %s1815_s11, 1024 }
 0x4db   : > { %p1817_p8 = scmp.lt.s32.totalorder %s2330_s14, %s1815_s11  ;;  %p1818_p3 = scmp.lt.s32.totalorder %s1816_s10, %s1810_s1 }
 0x4dc   : > { %p1813_p9 = pneg %p1812_p4 }
 0x4dd   : > { %p1819_p12 = por %p1818_p3, %p1817_p8 }
 0x4df   : > { %p1820_p13 = pnand %p1819_p12, %p1813_p9 }
 0x4e1   : > { %1823 = shalt.err (!%p1820_p13)
}
 0x4e2   : > { %s1824_s24 = scalar_lea.hbm %s2337_s27, 512  ;;  %s1828_s6 = scalar_lea.hbm %s2460_s23, 1024 }
 0x4e3   : > { %p1825_p0 = scmp.ne.s32.totalorder %s2337_s27, %s1824_s24  ;;  %p1829_p6 = scmp.lt.u32.totalorder %s2337_s27, %s2460_s23 }
 0x4e4   : > { %p1830_p10 = scmp.lt.u32.totalorder %s1828_s6, %s1824_s24  ;;  %p1832_p2 = scmp.lt.u32.totalorder %s1824_s24, %s2337_s27 }
 0x4e5   : > { %p1826_p11 = pnand %p1825_p0, %p2461_p5 }
 0x4e6   : > { %p1831_p1 = por %p1830_p10, %p1829_p6 }
 0x4e7   : > { %p1827_p7 = pneg %p1826_p11 }
 0x4e8   : > { %p1833_p4 = por %p1832_p2, %p1831_p1 }
 0x4ea   : > { %p1834_p9 = pnand %p1833_p4, %p1827_p7 }
 0x4ec   : > { %1837 = shalt.err (!%p1834_p9)
}
 0x4ed   : > { %s1923_s0 = smov 128   ;;  %s1924_s1 = smov 8  }
 0x4ee   : > { %1509 = dma.vmem_to_hbm [thread:$0]  (%p2461_p5), %s2330_s14, 512, %s2337_s27, %s1117_s2, %s1923_s0, %s1923_s0, %s1924_s1  }
 0x4ef PF: > { %s1162_s30 = sand.u32 1, %s1888_s17   ;;  %p2462_p8 = scmp.ne.s32.totalorder %s2450_s26, 0 }
 0x4f0   : > { %p2463_p3 = scmp.ge.s32.totalorder %s1908_s22, 2  ;;  %s1163_s11 = scalar_lea.sflag [#allocation5], %s1162_s30 }
 0x4f2   : > { %p1534_p12 = pnand %p2463_p3, %p2462_p8 }
 0x4f4   : > { %1879 = dma.done.wait (!%p1534_p12), %s1163_s11, 512  }
 0x4f5   : > { %1881 = vsyncadd (!%p1534_p12), %s1163_s11, 4294966784  ;;  %s1172_s10 = scalar_lea.sflag [#allocation16], %s1162_s30 }
 0x4f6   : > { %1883 = dma.done.wait (!%p1534_p12), %s1172_s10, 16  }
 0x4f7   : > { %1885 = vsyncadd (!%p1534_p12), %s1172_s10, 4294967280  ;;  %s34_s22 = sadd.s32 1, %s1908_s22   ;;  %s2464_s17 = smov %s1892_s18 }
 0x4f8   : > { %p31_p13 = scmp.ge.s32.totalorder %s34_s22, 4   ;;  %s2465_s18 = smov %s1896_s19 }
 0x4f9   : > { %s2466_s19 = smov %s2195_s20  ;;  %s2467_s20 = smov %s1904_s21 }
 0x4fa   : > { %s2468_s21 = smov %s2470_s28  ;;  %33 = sbr.rel (!%p31_p13) target bundleno = 19 (0x13), region = 150 }
 0x501   :  { %1176 = vsyncpa [#allocation4], 1 }
 0x502   :  { %1178 = vsyncpa [#allocation4 + $0x1], 1 }
 0x503   :  { %1179 = vsyncpa [#allocation7], 1 }
 0x504   :  { %1180 = vsyncpa [#allocation10], 1 }
 0x505   :  { %1181 = vsyncpa [#allocation13], 1 }
 0x506   :  { %1182 = vsyncpa [#allocation5], 1 }
 0x507   :  { %1184 = vsyncpa [#allocation5 + $0x1], 1 }
 0x508   :  { %1185 = vsyncpa [#allocation16], 1 }
 0x509   :  { %1187 = vsyncpa [#allocation16 + $0x1], 1 }

</bundles_post_ra>
